<compile_context>
chip_gen: v6e
topology: v6e:2x2x1
jax: 0.10.0
libtpu: 0.0.40
codegen_flags: <defaults>
</compile_context>

<pallas_src>
import jax
import jax.numpy as jnp
from jax.experimental import pallas as pl
from jax.experimental.pallas import tpu as pltpu


# ----------------------------------------------------------------------------
# BN folding (hoisted out of the forward pass; run once per network).
# ----------------------------------------------------------------------------
def _fold_cba(p, eps):
    """Fold Conv2d(1x1) + BatchNorm2d(inference) into (W_mat, bias)."""
    cout, cin = p["w"].shape[:2]
    inv_std = jax.lax.rsqrt(p["var"].astype(jnp.float32) + eps)
    scale = p["gamma"].astype(jnp.float32) * inv_std                          # (Cout,)
    w_mat = p["w"].reshape(cout, cin).astype(jnp.float32) * scale[:, None]    # (Cout, Cin)
    bias = ((p["b"].astype(jnp.float32) - p["mean"].astype(jnp.float32)) * scale
            + p["beta"].astype(jnp.float32)).reshape(cout, 1)                 # (Cout, 1)
    return w_mat, bias


def prepare_csp_params(params, *, bn=1, eps=1e-5, io_dtype=None):
    """Fold BN into every CBa once.  Returns flat (weights, biases) lists in
    layer order [f, bypass, dens_first, unit_0a, unit_0b, ..., l]."""
    layers = [params["f_cba"], params["bypass_cba"], params["dens_first"]]
    for i in range(bn):
        layers += [params["units"][i][0], params["units"][i][1]]
    layers.append(params["l_cba"])
    ws, bs = [], []
    for p in layers:
        w, b = _fold_cba(p, eps)
        if io_dtype is not None:
            w = w.astype(io_dtype)   # bf16 weights halve HBM/VMEM bytes (v6e/v7x)
        ws.append(w)
        bs.append(b)                 # bias / epilogue stays f32 on every generation
    return ws, bs


# ----------------------------------------------------------------------------
# Fully fused CSPx kernel: all CBas + DensUnit concats + final CSP concat.
# ----------------------------------------------------------------------------
def _make_csp_kernel(bn, n_layers, c_byp):
    def kernel(*refs):
        x_ref = refs[0]
        w = refs[1:1 + n_layers]
        b = refs[1 + n_layers:1 + 2 * n_layers]
        o_ref = refs[1 + 2 * n_layers]

        def cba(h, wi, bi):
            # (Cout, Cin) @ (Cin, t_hw) on the MXU, f32 accumulate, f32 epilogue.
            acc = jnp.dot(wi[...], h.astype(wi.dtype),
                          preferred_element_type=jnp.float32)
            return jnp.maximum(acc + bi[...], 0.0)

        h = cba(x_ref[...], w[0], b[0])              # f_cba
        byp = cba(h, w[1], b[1])                     # bypass_cba
        d = cba(h, w[2], b[2])                       # DensBlock leading CBa
        for i in range(bn):                          # DensUnits: two CBas + concat
            t = cba(d, w[3 + 2 * i], b[3 + 2 * i])
            t = cba(t, w[4 + 2 * i], b[4 + 2 * i])
            d = jnp.concatenate([d, t], axis=0)      # on-chip (sublane) channel concat
        lout = cba(d, w[3 + 2 * bn], b[3 + 2 * bn])  # l_cba

        # CSP concat: write each branch at its channel offset (no HBM concat pass).
        o_ref[:c_byp, :] = byp.astype(o_ref.dtype)
        o_ref[c_byp:, :] = lout.astype(o_ref.dtype)

    return kernel


# ----------------------------------------------------------------------------
# VMEM budgeting (generation-aware: v5e/v6e 128 MiB, v7x 64 MiB physical).
# ----------------------------------------------------------------------------
def _vmem_budget_bytes():
    try:
        cap = int(pltpu.get_tpu_info().vmem_capacity_bytes)
    except Exception:
        cap = 64 * 2**20        # conservative fallback (= v7x)
    return int(0.7 * cap)


def _footprint_bytes(cin, c_out, t_hw, in_isz, out_isz, ws, bs):
    w_bytes = sum(int(w.size) * jnp.dtype(w.dtype).itemsize for w in ws)
    b_bytes = sum(int(b.size) * 4 for b in bs)
    live_rows = cin + 2 * sum(int(w.shape[0]) for w in ws)   # f32 intermediates allowance
    return (2 * cin * t_hw * in_isz         # double-buffered activation input blocks
            + 2 * c_out * t_hw * out_isz    # double-buffered output blocks
            + 2 * (w_bytes + b_bytes)       # resident weights / biases
            + live_rows * t_hw * 4)


# ----------------------------------------------------------------------------
# Fused CSPx forward.  NCHW in / NCHW out.  One pallas_call total.
# ----------------------------------------------------------------------------
def csp_x_forward_fused(x, ws, bs, *, bn=1, strides=(2, 1, 1), t_hw_max=1024,
                        io_dtype=None):
    out_dtype = x.dtype
    N, Cin, H, W = x.shape
    n_layers = 4 + 2 * bn
    assert len(ws) == n_layers and len(bs) == n_layers

    s0 = strides[0]
    sh, sw = (s0, s0) if isinstance(s0, int) else s0
    for s in (strides[-1], strides[-2]):
        ss = (s, s) if isinstance(s, int) else tuple(s)
        assert ss == (1, 1), "TODO(synk): non-unit bypass/l strides not fused"

    if sh != 1 or sw != 1:
        # TODO(synk): fold this subsample into the kernel's input DMA
        # (sublane-strided H read + in-kernel W column selection).
        x = x[:, :, ::sh, ::sw]
    Ho, Wo = x.shape[2], x.shape[3]
    HW = Ho * Wo

    c_byp = int(ws[1].shape[0])
    c_l = int(ws[-1].shape[0])
    c_out = c_byp + c_l

    x_flat = x.reshape(N, Cin, HW)                 # NCHW-native, free reshape
    if io_dtype is not None:
        x_flat = x_flat.astype(io_dtype)           # bf16 I/O knob (v5e/v6e/v7x)

    # ---- spatial tiling: lane-dense (multiple-of-128) tiles, never padded ----
    assert t_hw_max % 128 == 0
    if HW % 128 == 0:
        t_hw = min(HW, t_hw_max)
    elif HW <= t_hw_max:
        t_hw = HW            # single full-extent tile (legal block shape)
    else:
        t_hw = t_hw_max      # ragged last tile handled by Pallas boundary masking

    # Megacore (v7x has 2 TensorCores): ensure >= 2 parallel grid blocks.
    if N * pl.cdiv(HW, t_hw) < 2 and t_hw % 256 == 0:
        t_hw //= 2

    in_isz = jnp.dtype(x_flat.dtype).itemsize
    out_isz = jnp.dtype(out_dtype).itemsize
    budget = _vmem_budget_bytes()
    while t_hw % 256 == 0 and _footprint_bytes(Cin, c_out, t_hw, in_isz, out_isz,
                                               ws, bs) > budget:
        t_hw //= 2
    vmem_limit = int(min(budget,
                         max(32 * 2**20,
                             2 * _footprint_bytes(Cin, c_out, t_hw, in_isz,
                                                  out_isz, ws, bs))))

    grid = (N, pl.cdiv(HW, t_hw))

    # Weights / biases: full blocks, constant index_map -> DMA'd once, resident.
    w_specs = [pl.BlockSpec(tuple(w.shape), lambda n, j: (0, 0)) for w in ws]
    b_specs = [pl.BlockSpec(tuple(b.shape), lambda n, j: (0, 0)) for b in bs]

    out_flat = pl.pallas_call(
        _make_csp_kernel(bn, n_layers, c_byp),
        out_shape=jax.ShapeDtypeStruct((N, c_out, HW), out_dtype),
        grid_spec=pltpu.PrefetchScalarGridSpec(
            num_scalar_prefetch=0,
            grid=grid,
            in_specs=[pl.BlockSpec((None, Cin, t_hw), lambda n, j: (n, 0, j))]
                     + w_specs + b_specs,
            out_specs=pl.BlockSpec((None, c_out, t_hw), lambda n, j: (n, 0, j)),
        ),
        compiler_params=pltpu.CompilerParams(
            dimension_semantics=("parallel", "parallel"),
            vmem_limit_bytes=vmem_limit,
        ),
    )(x_flat, *ws, *bs)

    return out_flat.reshape(N, c_out, Ho, Wo)


# ----------------------------------------------------------------------------
# Pure-JAX reference (unfused), mirroring the PyTorch module layer by layer.
# ----------------------------------------------------------------------------
def _cba_1x1_reference(x, p, *, stride=(1, 1), eps=1e-5):
    sh, sw = stride
    xs = x[:, :, ::sh, ::sw] if (sh != 1 or sw != 1) else x
    cout, cin = p["w"].shape[:2]
    conv = jnp.einsum("nchw,oc->nohw", xs, p["w"].reshape(cout, cin))
    conv = conv + p["b"][None, :, None, None]
    inv_std = jax.lax.rsqrt(p["var"] + eps)
    y = (conv - p["mean"][None, :, None, None]) * inv_std[None, :, None, None]
    y = y * p["gamma"][None, :, None, None] + p["beta"][None, :, None, None]
    return jnp.maximum(y, 0.0)


def csp_x_reference(x, params, *, bn=1, strides=(2, 1, 1), eps=1e-5):
    def run(h, p, s):
        s2 = (s, s) if isinstance(s, int) else s
        return _cba_1x1_reference(h, p, stride=s2, eps=eps)

    h0 = run(x, params["f_cba"], strides[0])
    bypass = run(h0, params["bypass_cba"], strides[-1])
    h = run(h0, params["dens_first"], 1)
    for i in range(bn):
        t = run(h, params["units"][i][0], 1)
        t = run(t, params["units"][i][1], 1)
        h = jnp.concatenate([h, t], axis=1)          # DensUnit: cat((x, CBas(x)), 1)
    l_out = run(h, params["l_cba"], strides[-2])
    return jnp.concatenate([bypass, l_out], axis=1)  # CSPx: cat((bypass, l), 1)


def make_cba_params(key, cin, cout):
    ks = jax.random.split(key, 6)
    return dict(
        w=jax.random.normal(ks[0], (cout, cin, 1, 1), jnp.float32) * (cin ** -0.5),
        b=jax.random.normal(ks[1], (cout,), jnp.float32) * 0.1,
        gamma=1.0 + 0.1 * jax.random.normal(ks[2], (cout,), jnp.float32),
        beta=0.1 * jax.random.normal(ks[3], (cout,), jnp.float32),
        mean=0.1 * jax.random.normal(ks[4], (cout,), jnp.float32),
        var=jax.random.uniform(ks[5], (cout,), jnp.float32, minval=0.5, maxval=1.5),
    )


if __name__ == "__main__":
    key = jax.random.PRNGKey(0)
    kx, *pkeys = jax.random.split(key, 8)

    # CSPx(act=nn.ReLU, bn=1, in_channel=4, out_channels=(8, (8, 8), 8, 8),
    #      kernels=((1,1), ((1,1),(1,1)), (1,1), (1,1)), strides=(2, 1, 1))
    N, Cin, H, W = 2, 4, 16, 16
    c_f, (c_a, c_b), c_l, c_byp = 8, (8, 8), 8, 8
    bn = 1
    strides = (2, 1, 1)

    params = {
        "f_cba":      make_cba_params(pkeys[0], Cin, c_f),        # 4  -> 8, stride 2
        "bypass_cba": make_cba_params(pkeys[1], c_f, c_byp),      # 8  -> 8
        "dens_first": make_cba_params(pkeys[2], c_f, c_b),        # 8  -> 8
        "units": [(make_cba_params(pkeys[3], c_b, c_a),           # 8  -> 8
                   make_cba_params(pkeys[4], c_a, c_b))],         # 8  -> 8
        "l_cba":      make_cba_params(pkeys[5], c_a + c_b, c_l),  # 16 -> 8
    }

    x = jax.random.normal(kx, (N, Cin, H, W), jnp.float32)

    ref = csp_x_reference(x, params, bn=bn, strides=strides)
    expected_shape = (N, c_byp + c_l, H // strides[0], W // strides[0])

    # f32 I/O path (exact comparison against the unfused reference).
    ws, bs = prepare_csp_params(params, bn=bn)                    # BN folding hoisted
    y = csp_x_forward_fused(x, ws, bs, bn=bn, strides=strides)
    y = jax.block_until_ready(y)
    assert y.shape == expected_shape, y.shape
    max_err = float(jnp.max(jnp.abs(y - ref)))
    assert jnp.allclose(y, ref, atol=1e-3, rtol=1e-3), max_err

    # bf16 I/O path (v6e/v7x bandwidth knob): f32 accumulate + f32 epilogue.
    ws16, bs16 = prepare_csp_params(params, bn=bn, io_dtype=jnp.bfloat16)
    y16 = csp_x_forward_fused(x, ws16, bs16, bn=bn, strides=strides,
                              io_dtype=jnp.bfloat16)
    y16 = jax.block_until_ready(y16)
    max_err16 = float(jnp.max(jnp.abs(y16 - ref)))
    assert jnp.allclose(y16, ref, atol=2.5e-1, rtol=1e-1), max_err16

    print("KERNEL_OK")
</pallas_src>

<mosaic_0001>
module attributes {stable_mosaic.version = 11 : i64} {
  func.func @kernel(%arg0: i32, %arg1: i32, %arg2: memref<1x4x64xf32, #tpu.memory_space<vmem>>, %arg3: memref<8x4xf32, #tpu.memory_space<vmem>>, %arg4: memref<8x8xf32, #tpu.memory_space<vmem>>, %arg5: memref<8x8xf32, #tpu.memory_space<vmem>>, %arg6: memref<8x8xf32, #tpu.memory_space<vmem>>, %arg7: memref<8x8xf32, #tpu.memory_space<vmem>>, %arg8: memref<8x16xf32, #tpu.memory_space<vmem>>, %arg9: memref<8x1xf32, #tpu.memory_space<vmem>>, %arg10: memref<8x1xf32, #tpu.memory_space<vmem>>, %arg11: memref<8x1xf32, #tpu.memory_space<vmem>>, %arg12: memref<8x1xf32, #tpu.memory_space<vmem>>, %arg13: memref<8x1xf32, #tpu.memory_space<vmem>>, %arg14: memref<8x1xf32, #tpu.memory_space<vmem>>, %arg15: memref<1x16x64xf32, #tpu.memory_space<vmem>>) attributes {dimension_semantics = [#tpu.dimension_semantics<parallel>, #tpu.dimension_semantics<parallel>], iteration_bounds = array<i64: 2, 1>, scalar_prefetch = 0 : i64, scratch_operands = 0 : i64, tpu.core_type = #tpu.core_type<tc>, window_params = [{transform_indices = @transform_0, window_bounds = array<i64: 1, 4, 64>}, {pipeline_mode = #tpu.pipeline_mode<synchronous>, transform_indices = @transform_1, window_bounds = array<i64: 8, 4>}, {pipeline_mode = #tpu.pipeline_mode<synchronous>, transform_indices = @transform_2, window_bounds = array<i64: 8, 8>}, {pipeline_mode = #tpu.pipeline_mode<synchronous>, transform_indices = @transform_3, window_bounds = array<i64: 8, 8>}, {pipeline_mode = #tpu.pipeline_mode<synchronous>, transform_indices = @transform_4, window_bounds = array<i64: 8, 8>}, {pipeline_mode = #tpu.pipeline_mode<synchronous>, transform_indices = @transform_5, window_bounds = array<i64: 8, 8>}, {pipeline_mode = #tpu.pipeline_mode<synchronous>, transform_indices = @transform_6, window_bounds = array<i64: 8, 16>}, {pipeline_mode = #tpu.pipeline_mode<synchronous>, transform_indices = @transform_7, window_bounds = array<i64: 8, 1>}, {pipeline_mode = #tpu.pipeline_mode<synchronous>, transform_indices = @transform_8, window_bounds = array<i64: 8, 1>}, {pipeline_mode = #tpu.pipeline_mode<synchronous>, transform_indices = @transform_9, window_bounds = array<i64: 8, 1>}, {pipeline_mode = #tpu.pipeline_mode<synchronous>, transform_indices = @transform_10, window_bounds = array<i64: 8, 1>}, {pipeline_mode = #tpu.pipeline_mode<synchronous>, transform_indices = @transform_11, window_bounds = array<i64: 8, 1>}, {pipeline_mode = #tpu.pipeline_mode<synchronous>, transform_indices = @transform_12, window_bounds = array<i64: 8, 1>}, {transform_indices = @transform_13, window_bounds = array<i64: 1, 16, 64>}]} {
    %c0 = arith.constant 0 : index
    %c0_0 = arith.constant 0 : index
    %c0_1 = arith.constant 0 : index
    %0 = vector.load %arg2[%c0, %c0_0, %c0_1] : memref<1x4x64xf32, #tpu.memory_space<vmem>>, vector<1x4x64xf32>
    %1 = vector.shape_cast %0 : vector<1x4x64xf32> to vector<4x64xf32>
    %c0_2 = arith.constant 0 : index
    %c0_3 = arith.constant 0 : index
    %2 = vector.load %arg3[%c0_2, %c0_3] : memref<8x4xf32, #tpu.memory_space<vmem>>, vector<8x4xf32>
    %cst = arith.constant dense<0.000000e+00> : vector<8x64xf32>
    %3 = tpu.matmul %2, %1, %cst {dimension_numbers = #tpu.dot_dimension_numbers<[1], [0], [0], [1], [0, 0, 1, 1], [], []>} : vector<8x4xf32>, vector<4x64xf32>, vector<8x64xf32> -> vector<8x64xf32>
    %c0_4 = arith.constant 0 : index
    %c0_5 = arith.constant 0 : index
    %4 = vector.load %arg9[%c0_4, %c0_5] : memref<8x1xf32, #tpu.memory_space<vmem>>, vector<8x1xf32>
    %5 = vector.broadcast %4 : vector<8x1xf32> to vector<8x64xf32>
    %6 = arith.addf %3, %5 : vector<8x64xf32>
    %cst_6 = arith.constant 0.000000e+00 : f32
    %7 = vector.broadcast %cst_6 : f32 to vector<8x64xf32>
    %8 = arith.maximumf %6, %7 : vector<8x64xf32>
    %c0_7 = arith.constant 0 : index
    %c0_8 = arith.constant 0 : index
    %9 = vector.load %arg4[%c0_7, %c0_8] : memref<8x8xf32, #tpu.memory_space<vmem>>, vector<8x8xf32>
    %cst_9 = arith.constant dense<0.000000e+00> : vector<8x64xf32>
    %10 = tpu.matmul %9, %8, %cst_9 {dimension_numbers = #tpu.dot_dimension_numbers<[1], [0], [0], [1], [0, 0, 1, 1], [], []>} : vector<8x8xf32>, vector<8x64xf32>, vector<8x64xf32> -> vector<8x64xf32>
    %c0_10 = arith.constant 0 : index
    %c0_11 = arith.constant 0 : index
    %11 = vector.load %arg10[%c0_10, %c0_11] : memref<8x1xf32, #tpu.memory_space<vmem>>, vector<8x1xf32>
    %12 = vector.broadcast %11 : vector<8x1xf32> to vector<8x64xf32>
    %13 = arith.addf %10, %12 : vector<8x64xf32>
    %cst_12 = arith.constant 0.000000e+00 : f32
    %14 = vector.broadcast %cst_12 : f32 to vector<8x64xf32>
    %15 = arith.maximumf %13, %14 : vector<8x64xf32>
    %c0_13 = arith.constant 0 : index
    %c0_14 = arith.constant 0 : index
    %16 = vector.load %arg5[%c0_13, %c0_14] : memref<8x8xf32, #tpu.memory_space<vmem>>, vector<8x8xf32>
    %cst_15 = arith.constant dense<0.000000e+00> : vector<8x64xf32>
    %17 = tpu.matmul %16, %8, %cst_15 {dimension_numbers = #tpu.dot_dimension_numbers<[1], [0], [0], [1], [0, 0, 1, 1], [], []>} : vector<8x8xf32>, vector<8x64xf32>, vector<8x64xf32> -> vector<8x64xf32>
    %c0_16 = arith.constant 0 : index
    %c0_17 = arith.constant 0 : index
    %18 = vector.load %arg11[%c0_16, %c0_17] : memref<8x1xf32, #tpu.memory_space<vmem>>, vector<8x1xf32>
    %19 = vector.broadcast %18 : vector<8x1xf32> to vector<8x64xf32>
    %20 = arith.addf %17, %19 : vector<8x64xf32>
    %cst_18 = arith.constant 0.000000e+00 : f32
    %21 = vector.broadcast %cst_18 : f32 to vector<8x64xf32>
    %22 = arith.maximumf %20, %21 : vector<8x64xf32>
    %c0_19 = arith.constant 0 : index
    %c0_20 = arith.constant 0 : index
    %23 = vector.load %arg6[%c0_19, %c0_20] : memref<8x8xf32, #tpu.memory_space<vmem>>, vector<8x8xf32>
    %cst_21 = arith.constant dense<0.000000e+00> : vector<8x64xf32>
    %24 = tpu.matmul %23, %22, %cst_21 {dimension_numbers = #tpu.dot_dimension_numbers<[1], [0], [0], [1], [0, 0, 1, 1], [], []>} : vector<8x8xf32>, vector<8x64xf32>, vector<8x64xf32> -> vector<8x64xf32>
    %c0_22 = arith.constant 0 : index
    %c0_23 = arith.constant 0 : index
    %25 = vector.load %arg12[%c0_22, %c0_23] : memref<8x1xf32, #tpu.memory_space<vmem>>, vector<8x1xf32>
    %26 = vector.broadcast %25 : vector<8x1xf32> to vector<8x64xf32>
    %27 = arith.addf %24, %26 : vector<8x64xf32>
    %cst_24 = arith.constant 0.000000e+00 : f32
    %28 = vector.broadcast %cst_24 : f32 to vector<8x64xf32>
    %29 = arith.maximumf %27, %28 : vector<8x64xf32>
    %c0_25 = arith.constant 0 : index
    %c0_26 = arith.constant 0 : index
    %30 = vector.load %arg7[%c0_25, %c0_26] : memref<8x8xf32, #tpu.memory_space<vmem>>, vector<8x8xf32>
    %cst_27 = arith.constant dense<0.000000e+00> : vector<8x64xf32>
    %31 = tpu.matmul %30, %29, %cst_27 {dimension_numbers = #tpu.dot_dimension_numbers<[1], [0], [0], [1], [0, 0, 1, 1], [], []>} : vector<8x8xf32>, vector<8x64xf32>, vector<8x64xf32> -> vector<8x64xf32>
    %c0_28 = arith.constant 0 : index
    %c0_29 = arith.constant 0 : index
    %32 = vector.load %arg13[%c0_28, %c0_29] : memref<8x1xf32, #tpu.memory_space<vmem>>, vector<8x1xf32>
    %33 = vector.broadcast %32 : vector<8x1xf32> to vector<8x64xf32>
    %34 = arith.addf %31, %33 : vector<8x64xf32>
    %cst_30 = arith.constant 0.000000e+00 : f32
    %35 = vector.broadcast %cst_30 : f32 to vector<8x64xf32>
    %36 = arith.maximumf %34, %35 : vector<8x64xf32>
    %37 = tpu.concatenate %22, %36 in 0 : vector<8x64xf32>, vector<8x64xf32> -> vector<16x64xf32>
    %c0_31 = arith.constant 0 : index
    %c0_32 = arith.constant 0 : index
    %38 = vector.load %arg8[%c0_31, %c0_32] : memref<8x16xf32, #tpu.memory_space<vmem>>, vector<8x16xf32>
    %cst_33 = arith.constant dense<0.000000e+00> : vector<8x64xf32>
    %39 = tpu.matmul %38, %37, %cst_33 {dimension_numbers = #tpu.dot_dimension_numbers<[1], [0], [0], [1], [0, 0, 1, 1], [], []>} : vector<8x16xf32>, vector<16x64xf32>, vector<8x64xf32> -> vector<8x64xf32>
    %c0_34 = arith.constant 0 : index
    %c0_35 = arith.constant 0 : index
    %40 = vector.load %arg14[%c0_34, %c0_35] : memref<8x1xf32, #tpu.memory_space<vmem>>, vector<8x1xf32>
    %41 = vector.broadcast %40 : vector<8x1xf32> to vector<8x64xf32>
    %42 = arith.addf %39, %41 : vector<8x64xf32>
    %cst_36 = arith.constant 0.000000e+00 : f32
    %43 = vector.broadcast %cst_36 : f32 to vector<8x64xf32>
    %44 = arith.maximumf %42, %43 : vector<8x64xf32>
    %c0_37 = arith.constant 0 : index
    %c0_38 = arith.constant 0 : index
    %c0_39 = arith.constant 0 : index
    %45 = vector.load %arg15[%c0_37, %c0_38, %c0_39] : memref<1x16x64xf32, #tpu.memory_space<vmem>>, vector<1x8x64xf32>
    %46 = vector.shape_cast %45 : vector<1x8x64xf32> to vector<8x64xf32>
    %47 = vector.shape_cast %15 : vector<8x64xf32> to vector<1x8x64xf32>
    tpu.vector_store %arg15[%c0_37, %c0_38, %c0_39], %47 {strides = array<i32>} : memref<1x16x64xf32, #tpu.memory_space<vmem>>, vector<1x8x64xf32>,
    %c0_40 = arith.constant 0 : index
    %c8 = arith.constant 8 : index
    %c0_41 = arith.constant 0 : index
    %48 = vector.load %arg15[%c0_40, %c8, %c0_41] : memref<1x16x64xf32, #tpu.memory_space<vmem>>, vector<1x8x64xf32>
    %49 = vector.shape_cast %48 : vector<1x8x64xf32> to vector<8x64xf32>
    %50 = vector.shape_cast %44 : vector<8x64xf32> to vector<1x8x64xf32>
    tpu.vector_store %arg15[%c0_40, %c8, %c0_41], %50 {strides = array<i32>} : memref<1x16x64xf32, #tpu.memory_space<vmem>>, vector<1x8x64xf32>,
    return
  }
  func.func @transform_0(%arg0: i32, %arg1: i32) -> (i32, i32, i32) {
    %c0_i32 = arith.constant 0 : i32
    %c0_i32_0 = arith.constant 0 : i32
    return %arg0, %c0_i32, %arg1 : i32, i32, i32
  }
  func.func @transform_1(%arg0: i32, %arg1: i32) -> (i32, i32) {
    %c0_i32 = arith.constant 0 : i32
    %c0_i32_0 = arith.constant 0 : i32
    %c0_i32_1 = arith.constant 0 : i32
    return %c0_i32, %c0_i32_0 : i32, i32
  }
  func.func @transform_2(%arg0: i32, %arg1: i32) -> (i32, i32) {
    %c0_i32 = arith.constant 0 : i32
    %c0_i32_0 = arith.constant 0 : i32
    %c0_i32_1 = arith.constant 0 : i32
    return %c0_i32, %c0_i32_0 : i32, i32
  }
  func.func @transform_3(%arg0: i32, %arg1: i32) -> (i32, i32) {
    %c0_i32 = arith.constant 0 : i32
    %c0_i32_0 = arith.constant 0 : i32
    %c0_i32_1 = arith.constant 0 : i32
    return %c0_i32, %c0_i32_0 : i32, i32
  }
  func.func @transform_4(%arg0: i32, %arg1: i32) -> (i32, i32) {
    %c0_i32 = arith.constant 0 : i32
    %c0_i32_0 = arith.constant 0 : i32
    %c0_i32_1 = arith.constant 0 : i32
    return %c0_i32, %c0_i32_0 : i32, i32
  }
  func.func @transform_5(%arg0: i32, %arg1: i32) -> (i32, i32) {
    %c0_i32 = arith.constant 0 : i32
    %c0_i32_0 = arith.constant 0 : i32
    %c0_i32_1 = arith.constant 0 : i32
    return %c0_i32, %c0_i32_0 : i32, i32
  }
  func.func @transform_6(%arg0: i32, %arg1: i32) -> (i32, i32) {
    %c0_i32 = arith.constant 0 : i32
    %c0_i32_0 = arith.constant 0 : i32
    %c0_i32_1 = arith.constant 0 : i32
    return %c0_i32, %c0_i32_0 : i32, i32
  }
  func.func @transform_7(%arg0: i32, %arg1: i32) -> (i32, i32) {
    %c0_i32 = arith.constant 0 : i32
    %c0_i32_0 = arith.constant 0 : i32
    %c0_i32_1 = arith.constant 0 : i32
    return %c0_i32, %c0_i32_0 : i32, i32
  }
  func.func @transform_8(%arg0: i32, %arg1: i32) -> (i32, i32) {
    %c0_i32 = arith.constant 0 : i32
    %c0_i32_0 = arith.constant 0 : i32
    %c0_i32_1 = arith.constant 0 : i32
    return %c0_i32, %c0_i32_0 : i32, i32
  }
  func.func @transform_9(%arg0: i32, %arg1: i32) -> (i32, i32) {
    %c0_i32 = arith.constant 0 : i32
    %c0_i32_0 = arith.constant 0 : i32
    %c0_i32_1 = arith.constant 0 : i32
    return %c0_i32, %c0_i32_0 : i32, i32
  }
  func.func @transform_10(%arg0: i32, %arg1: i32) -> (i32, i32) {
    %c0_i32 = arith.constant 0 : i32
    %c0_i32_0 = arith.constant 0 : i32
    %c0_i32_1 = arith.constant 0 : i32
    return %c0_i32, %c0_i32_0 : i32, i32
  }
  func.func @transform_11(%arg0: i32, %arg1: i32) -> (i32, i32) {
    %c0_i32 = arith.constant 0 : i32
    %c0_i32_0 = arith.constant 0 : i32
    %c0_i32_1 = arith.constant 0 : i32
    return %c0_i32, %c0_i32_0 : i32, i32
  }
  func.func @transform_12(%arg0: i32, %arg1: i32) -> (i32, i32) {
    %c0_i32 = arith.constant 0 : i32
    %c0_i32_0 = arith.constant 0 : i32
    %c0_i32_1 = arith.constant 0 : i32
    return %c0_i32, %c0_i32_0 : i32, i32
  }
  func.func @transform_13(%arg0: i32, %arg1: i32) -> (i32, i32, i32) {
    %c0_i32 = arith.constant 0 : i32
    %c0_i32_0 = arith.constant 0 : i32
    return %arg0, %c0_i32, %arg1 : i32, i32, i32
  }
}

</mosaic_0001>

<bundles_post_ra>
// kernel: tpu_custom_call.1
= control target key start
LH: loop header
LB: loop body
LE: loop exit
PB: predicated region body
PF: predicated region fallthrough
CT: control target
= control target key end

     0   :  { %s1513_s0 = inlined_call_operand.vmem [shape: f32[2,4,64], index: 0, kind: input, shape index: {}]   ;;  %s1514_s1 = inlined_call_operand.vmem [shape: f32[8,4], index: 1, kind: input, shape index: {}]   ;;  %s1515_s2 = inlined_call_operand.vmem [shape: f32[8,8], index: 2, kind: input, shape index: {}]   ;;  %s1516_s3 = inlined_call_operand.vmem [shape: f32[8,8], index: 3, kind: input, shape index: {}]   ;;  %s1517_s4 = inlined_call_operand.vmem [shape: f32[8,8], index: 4, kind: input, shape index: {}]   ;;  %s1518_s5 = inlined_call_operand.vmem [shape: f32[8,8], index: 5, kind: input, shape index: {}]   ;;  %s1519_s6 = inlined_call_operand.vmem [shape: f32[8,16], index: 6, kind: input, shape index: {}]   ;;  %s1520_s7 = inlined_call_operand.vmem [shape: f32[8,1], index: 7, kind: input, shape index: {}]   ;;  %s1521_s8 = inlined_call_operand.vmem [shape: f32[8,1], index: 8, kind: input, shape index: {}]   ;;  %s1522_s9 = inlined_call_operand.vmem [shape: f32[8,1], index: 9, kind: input, shape index: {}]   ;;  %s1523_s10 = inlined_call_operand.vmem [shape: f32[8,1], index: 10, kind: input, shape index: {}]   ;;  %s1524_s11 = inlined_call_operand.vmem [shape: f32[8,1], index: 11, kind: input, shape index: {}]   ;;  %s1525_s12 = inlined_call_operand.vmem [shape: f32[8,1], index: 12, kind: input, shape index: {}]   ;;  %s1526_s13 = inlined_call_operand.hbm [shape: f32[2,16,64], index: 13, kind: output, shape index: {}]  }
   0x1   :  { %1529 = sst [smem:[#allocation7_spill]] %s1513_s0 }
   0x2   :  { %1530 = sst [smem:[#allocation8_spill]] %s1520_s7 }
   0x3   :  { %18 = vsyncpa [#allocation3], 0 }
   0x4   :  { %20 = vsyncpa [#allocation3 + $0x1], 0  ;;  %s1329_s25 = smov 0   ;;  %s1331_s26 = smov 0  }
   0x5   :  { %s1333_s27 = smov 0   ;;  %s1335_s28 = smov 0  }
   0x6   :  { %s1337_s29 = smov 0   ;;  %s1339_s30 = smov 0  }
   0x7 LB: > { %1531 = sst [smem:[#allocation5_spill]] %s1247_s29  ;;  %s1048_s14 = sadd.s32 4294967295, %s1251_s30   ;;  %s1251_s30 = sphi %s1339_s30, %s26_s30   ;;  %s1247_s29 = sphi %s1337_s29, %s1538_s29   ;;  %s1243_s28 = sphi %s1335_s28, %s1537_s28   ;;  %s1239_s27 = sphi %s1333_s27, %s1541_s27   ;;  %s1235_s26 = sphi %s1331_s26, %s1540_s26   ;;  %s1231_s25 = sphi %s1329_s25, %s1539_s25  }
   0x8   : > { %s1049_s15 = sadd.s32 4294967294, %s1251_s30   ;;  %s38_s16 = sadd.s32 1, %s1247_s29 }
   0x9   : > { %s327_s17 = sadd.s32 1, %s1239_s27  ;;  %p40_p0 = scmp.ge.s32.totalorder %s38_s16, 2 }
   0xa   : > { %p337_p1 = scmp.ne.s32.totalorder %s1239_s27, %s1235_s26  ;;  %p338_p2 = scmp.eq.s32.totalorder %s1048_s14, 1 }
   0xb   : > { %p343_p3 = scmp.ne.s32.totalorder %s1235_s26, %s1231_s25  ;;  %s1543_s16 = smov (%p40_p0, %s38_s16), 0 }
   0xc   : > { %1532 = sst [smem:[#allocation6_spill]] %s1543_s16  ;;  %p1369_p4 = por %p338_p2, %p337_p1 }
   0xd   : > { %p344_p5 = scmp.eq.s32.totalorder %s1049_s15, 1  ;;  %s322_s19 = ssub.s32 %s1247_s29, %s1543_s16 }
   0xe   : > { %p1052_p6 = scmp.ge.s32.totalorder %s1251_s30, 1  ;;  %p325_p7 = scmp.eq.s32.totalorder %s322_s19, 0 }
   0xf   : > { %p1376_p8 = por %p344_p5, %p343_p3  ;;  %p408_p9 = scmp.lt.s32.totalorder %s1251_s30, 3 }
  0x10   : > { %s1382_s21 = scalar_select %p325_p7, %s1239_s27, %s327_s17  }
  0x11   : > { %p409_p10 = pnand %p1052_p6, %p408_p9 }
  0x12   : > { %p454_p11 = scmp.lt.s32.totalorder (!%p409_p10), %s1243_s28, 1  ;;  %s1535_s7 = sld [smem:[#allocation8_spill]] (!%p409_p10) }
  0x13   : > { %412 = sbr.rel (%p409_p10) target bundleno = 1035 (0x40b), region = 72  ;;  %s1536_s0 = sld [smem:[#allocation7_spill]] (!%p409_p10) }
  0x18   : > { %v1253_v0 = vmov 0.0   ;;  %vm1254_vm0 = vmmov 0   ;;  %v463_v1 = vld [vmem:[%s1535_s7] sm:$0xff]  ;;  %s455_s24 = scalar_select %p454_p11, %s1243_s28, 1  ;;  %v1255_v2 = vmov 0   ;;  %vm473_vm1 = vcmask 1043456  }
  0x19   : > { %1081 = vmatprep.subr.mxu0 %v1253_v0  ;;  %1083 = vmatprep.mubr.msk.f32.mxu0 %vm1254_vm0, %v1253_v0  ;;  %v631_v3 = vld [vmem:[%s1522_s9] sm:$0xff]  ;;  %vm469_vm2 = vcmask 31744   ;;  %vm555_vm3 = vcmask 64512   ;;  %s451_s7 = sand.u32 1, %s1235_s26   ;;  %vm955_vm4 = vcmask 523264   ;;  %vm880_vm5 = vcmask 130048  }
  0x1a   : > { %1173 = vset.pattern.permute.xlu0 %v1255_v2  ;;  %1086 = vmatprep.subr.mxu1 %v1253_v0  ;;  %s1054_s14 = sshll.u32 %s455_s24, 2  ;;  %v462_v4 = vld [vmem:[%s1514_s1] sm:$0xff]  ;;  %s1053_s16 = sshll.u32 %s451_s7, 4 }
  0x1b   : > { %466 = vperm.xlu0 %1173, %v463_v1   ;;  %1088 = vmatprep.mubr.msk.f32.mxu1 %vm1254_vm0, %v1253_v0  ;;  %s460_s22 = scalar_lea.vmem %s1536_s0, %s1054_s14  ;;  %v549_v6 = vld [vmem:[%s1521_s8] sm:$0xff]  ;;  %s1439_s29 = scalar_lea.vmem [#allocation2], %s1053_s16 }
  0x1c   : > { %1174 = vset.pattern.permute.xlu1 %v1255_v2  ;;  %v461_v5 = vld [vmem:[%s460_s22] sm:$0xf]  ;;  %s973_s24 = sshll.u32 %s1439_s29, 4  ;;  %s1067_s16 = sshll.u32 %s1243_s28, 8  ;;  %s1457_s24 = int_to_ptr.vmem [resolvable:$true] %s973_s24 }
  0x1d   : > { %1082 = vmatpush3.msk.msra.mxu0 %vm473_vm1, %v461_v5  ;;  %v548_v12 = vld [vmem:[%s1515_s2] sm:$0xff]  ;;  %s1462_s17 = scalar_lea.hbm %s1526_s13, %s1067_s16  ;;  %s1468_s19 = scalar_lea.sflag [#allocation3], %s451_s7 }
  0x1e   : > { %1084 = vmatmul.mubr.msk.f32.vlgmr.msra.gmra.mxu0 %vm469_vm2, %v462_v4  ;;  %1091 = vmatprep.subr.mxu0 %v1253_v0  ;;  %v630_v13 = vld [vmem:[%s1516_s3] sm:$0xff]  ;;  %s1175_s28 = scalar_lea.vmem %s1457_s24, 256  ;;  %s1256_s22 = smov [#allocation2]  }
  0x1f   : > { %634 = vperm.xlu0 %1173, %v631_v3   ;;  %1093 = vmatprep.mubr.msk.f32.mxu0 %vm1254_vm0, %v1253_v0  ;;  %v712_v14 = vld [vmem:[%s1523_s10] sm:$0xff]  ;;  %p1176_p12 = scmp.ne.s32.totalorder %s1457_s24, %s1175_s28  ;;  %s1179_s23 = sshll.u32 %s1256_s22, 4  ;;  %s1180_s23 = int_to_ptr.vmem [resolvable:$false] %s1179_s23 }
  0x20   : > { %715 = vperm.xlu1 %1174, %v712_v14   ;;  %v793_v15 = vld [vmem:[%s1524_s11] sm:$0xff]  ;;  %s1181_s0 = scalar_lea.vmem %s1180_s23, 512  ;;  %p1182_p1 = scmp.lt.s32.totalorder %s1457_s24, %s1180_s23 }
  0x21   : > { %v874_v16 = vld [vmem:[%s1525_s12] sm:$0xff]  ;;  %p1177_p13 = pnand %p1176_p12, %p1369_p4  ;;  %p1183_p2 = scmp.lt.s32.totalorder %s1181_s0, %s1175_s28 }
  0x22   : > { %v711_v26 = vld [vmem:[%s1517_s4] sm:$0xff] }
  0x23   : > { %552 = vperm.xlu0 %1173, %v549_v6   ;;  %v792_v33 = vld [vmem:[%s1518_s5] sm:$0xff]  ;;  %p1178_p0 = pneg %p1177_p13  ;;  %p1184_p3 = por %p1183_p2, %p1182_p1 }
  0x24   : > { %796 = vperm.xlu1 %1174, %v793_v15   ;;  %v873_v39 = vld [vmem:[%s1519_s6] sm:$0xff] }
  0x25   : > { %p1185_p5 = pnand %p1184_p3, %p1178_p0 }
  0x28   : > { %877 = vperm.xlu1 %1174, %v874_v16  }
  0x96   : > { %v467_v7 = vpop.permute.xlu0 %466 }
  0x9a   : > { %v635_v17 = vpop.permute.xlu0 %634 }
  0x9b   : > { %v716_v28 = vpop.permute.xlu1 %715 }
  0x9e   : > { %v553_v18 = vpop.permute.xlu0 %552 }
  0x9f   : > { %v797_v34 = vpop.permute.xlu1 %796 }
  0xa3   : > { %v878_v40 = vpop.permute.xlu1 %877 }
  0xde   : > { %v543_v8 = vpop.f32.mrf.mxu0 }
  0xdf   : > { %v544_v9 = vadd.f32 %v543_v8, %v467_v7 }
  0xe0   : > { %v1085_v10 = vpop.f32.mrf.mxu0 }
  0xe1   : > { %v547_v11 = vmax.f32 %v544_v9, 0.0 }
  0xe3   : > { %1087 = vmatpush3.msra.mxu1 %v547_v11  ;;  %1092 = vmatpush3.msra.mxu0 %v547_v11 }
  0xe4   : > { %1089 = vmatmul.mubr.msk.f32.vlgmr.msra.gmra.mxu1 %vm555_vm3, %v548_v12  ;;  %1094 = vmatmul.mubr.msk.f32.vlgmr.msra.gmra.mxu0 %vm555_vm3, %v630_v13 }
  0xe5   : > { %1096 = vmatprep.subr.mxu1 %v1253_v0  ;;  %1098 = vmatprep.mubr.msk.f32.mxu1 %vm1254_vm0, %v1253_v0 }
  0xe6   : > { %1101 = vmatprep.subr.mxu0 %v1253_v0  ;;  %1103 = vmatprep.mubr.msk.f32.mxu0 %vm1254_vm0, %v1253_v0 }
 0x1a4   : > { %v625_v19 = vpop.f32.mrf.mxu1  ;;  %v706_v20 = vpop.f32.mrf.mxu0 }
 0x1a5   : > { %v626_v21 = vadd.f32 %v625_v19, %v553_v18  ;;  %v707_v22 = vadd.f32 %v706_v20, %v635_v17 }
 0x1a6   : > { %v1095_v23 = vpop.f32.mrf.mxu0  ;;  %v1090_v27 = vpop.f32.mrf.mxu1 }
 0x1a7   : > { %v629_v24 = vmax.f32 %v626_v21, 0.0  ;;  %v710_v25 = vmax.f32 %v707_v22, 0.0 }
 0x1a9   : > { %956 = vst.msk [vmem:[%s1439_s29] sm:$0xff] %vm955_vm4, %v629_v24  ;;  %1097 = vmatpush3.msra.mxu1 %v710_v25 }
 0x1aa   : > { %1099 = vmatmul.mubr.msk.f32.vlgmr.msra.gmra.mxu1 %vm555_vm3, %v711_v26  ;;  %1106 = vmatprep.subr.mxu1 %v1253_v0 }
 0x1ab   : > { %1110 = vmatprep.mubr.msk.f32.mxu1 %vm1254_vm0, %v1253_v0 }
 0x26a   : > { %v787_v29 = vpop.f32.mrf.mxu1 }
 0x26b   : > { %v788_v30 = vadd.f32 %v787_v29, %v716_v28 }
 0x26c   : > { %v1100_v31 = vpop.f32.mrf.mxu1 }
 0x26d   : > { %v791_v32 = vmax.f32 %v788_v30, 0.0 }
 0x26f   : > { %1102 = vmatpush3.msra.mxu0 %v791_v32 }
 0x270   : > { %1104 = vmatmul.mubr.msk.f32.vlgmr.msra.gmra.mxu0 %vm555_vm3, %v792_v33 }
 0x330   : > { %v868_v35 = vpop.f32.mrf.mxu0 }
 0x331   : > { %v869_v36 = vadd.f32 %v868_v35, %v797_v34 }
 0x332   : > { %v1105_v37 = vpop.f32.mrf.mxu0 }
 0x333   : > { %v872_v38 = vmax.f32 %v869_v36, 0.0 }
 0x335   : > { %1107 = vmatpush3.msra.mxu1 %v872_v38 }
 0x336   : > { %1108 = vmatprep.subr.mxu1 %v1253_v0 }
 0x337   : > { %1109 = vmatpush3.msra.mxu1 %v710_v25 }
 0x338   : > { %1111 = vmatmul.mubr.msk.f32.vlgmr.msra.gmra.mxu1 %vm880_vm5, %v873_v39 }
 0x3f8   : > { %v950_v41 = vpop.f32.mrf.mxu1 }
 0x3f9   : > { %v951_v42 = vadd.f32 %v950_v41, %v878_v40 }
 0x3fa   : > { %v1112_v43 = vpop.f32.mrf.mxu1 }
 0x3fb   : > { %v954_v44 = vmax.f32 %v951_v42, 0.0 }
 0x3fd   : > { %957 = vst.msk [vmem:[%s1439_s29 + $0x8] sm:$0xff] %vm955_vm4, %v954_v44 }
 0x3fe   : > { %1188 = shalt.err (!%p1185_p5)
}
 0x3ff   : > { %s1189_s7 = scalar_lea.hbm %s1462_s17, 256  ;;  %s1193_s14 = scalar_lea.hbm %s1526_s13, 512 }
 0x400   : > { %p1190_p6 = scmp.ne.s32.totalorder %s1462_s17, %s1189_s7  ;;  %p1194_p10 = scmp.lt.s32.totalorder %s1462_s17, %s1526_s13 }
 0x401   : > { %p1195_p11 = scmp.lt.s32.totalorder %s1193_s14, %s1189_s7 }
 0x402   : > { %p1191_p7 = pnand %p1190_p6, %p1369_p4 }
 0x403   : > { %p1196_p12 = por %p1195_p11, %p1194_p10 }
 0x404   : > { %p1192_p9 = pneg %p1191_p7 }
 0x406   : > { %p1197_p13 = pnand %p1196_p12, %p1192_p9 }
 0x408   : > { %1200 = shalt.err (!%p1197_p13)
}
 0x409   : > { %s1257_s0 = smov 128   ;;  %s1258_s28 = smov 8  }
 0x40a   : > { %1113 = dma.vmem_to_hbm [thread:$0]  (%p1369_p4), %s1457_s24, 256, %s1462_s17, %s1468_s19, %s1257_s0, %s1257_s0, %s1258_s28  }
 0x40b PF: > { %p1119_p0 = scmp.ge.s32.totalorder %s1251_s30, 2  ;;  %s988_s23 = sand.u32 1, %s1231_s25  }
 0x40c   : > { %s989_s7 = scalar_lea.sflag [#allocation3], %s988_s23 }
 0x40d   : > { %p1116_p1 = pnand %p1119_p0, %p1376_p8 }
 0x40f   : > { %p1117_p2 = pneg %p1116_p1 }
 0x411   : > { %1226 = dma.done.wait (%p1117_p2), %s989_s7, 256  }
 0x412   : > { %1228 = vsyncadd (%p1117_p2), %s989_s7, 4294967040  ;;  %s26_s30 = sadd.s32 1, %s1251_s30   ;;  %s1537_s28 = sld [smem:[#allocation5_spill]] }
 0x413   : > { %p23_p3 = scmp.ge.s32.totalorder %s26_s30, 4   ;;  %s1538_s29 = sld [smem:[#allocation6_spill]] }
 0x414   : > { %s1539_s25 = smov %s1235_s26  ;;  %s1540_s26 = smov %s1239_s27 }
 0x415   : > { %s1541_s27 = smov %s1382_s21  ;;  %25 = sbr.rel (!%p23_p3) target bundleno = 7 (0x7), region = 107 }
 0x41a   :  { %994 = vsyncpa [#allocation3], 1 }
 0x41b   :  { %996 = vsyncpa [#allocation3 + $0x1], 1 }

</bundles_post_ra>
